<compile_context>
chip_gen: v6e
topology: v6e:2x2x1
jax: 0.10.0
libtpu: 0.0.40
codegen_flags: <defaults>
</compile_context>

<pallas_src>
import functools

import jax
import jax.numpy as jnp
from jax import lax
from jax.experimental import pallas as pl
from jax.experimental.pallas import tpu as pltpu

_LANES = 128
_SUBLANES = 8
_ROW_ALIGN = 16                      # (16, 128) tile => safe for bf16 inputs too
_ALIGN_ELEMS = _ROW_ALIGN * _LANES   # 2048: zero-copy reshape granularity
_SMALL_MAX_ROWS = 1024
_SMALL_MAX_ELEMS = 128 * 1024        # <= 512 KiB f32 per input held in VMEM


def _round_up(x, m):
    return (x + m - 1) // m * m


def _hw_config():
    """(num_splits, tile_row_cap, vmem_limit_bytes) for this TPU generation."""
    kind = ""
    try:
        kind = jax.devices()[0].device_kind.lower()
    except Exception:
        pass
    if "7" in kind:
        # v7x: 2 TensorCores per chip, only 64 MiB VMEM per TC.
        num_splits, tile_cap, vmem_limit = 2, 4096, 32 * 1024 * 1024
    elif "v2" in kind or "v3" in kind:
        # Old small-VMEM generations: stay conservative.
        num_splits, tile_cap, vmem_limit = 1, 1024, 8 * 1024 * 1024
    else:
        # v4 / v5e / v5p / v6e: 128 MiB VMEM, single pipelined core view.
        num_splits, tile_cap, vmem_limit = 1, 8192, 64 * 1024 * 1024
    # Secondary clamp from the queried VMEM capacity (only ever shrinks).
    try:
        vmem_cap = int(pltpu.get_tpu_info().vmem_capacity_bytes)
        tile_cap = min(tile_cap, max(_ROW_ALIGN, (vmem_cap // 32) // (_LANES * 4)))
        vmem_limit = min(vmem_limit, vmem_cap // 2)
    except Exception:
        pass
    return num_splits, tile_cap, vmem_limit


# ---------------------------------------------------------------------------
# Small-input path: one launch, full arrays in VMEM, in-kernel (1,1) reduce.
# ---------------------------------------------------------------------------
def _small_kernel(yp_ref, yt_ref, out_ref, *,
                  threshold_rot, alpha_rot, threshold_trans, alpha_trans,
                  inv_total):
    yt = yt_ref[...].astype(jnp.float32)
    yp = yp_ref[...].astype(jnp.float32)

    col = lax.broadcasted_iota(jnp.int32, yt.shape, dimension=1)
    is_rot = (col & 1) == 0
    thr = jnp.where(is_rot, threshold_rot, threshold_trans)
    alpha = jnp.where(is_rot, alpha_rot, alpha_trans)

    abs_yt = jnp.abs(yt)
    w = jnp.where(abs_yt >= thr, alpha * abs_yt, 1.0)
    diff = yp - yt
    sq = diff * diff * w

    s = jnp.sum(sq, axis=1, keepdims=True)   # (N, 1)
    s = jnp.sum(s, axis=0, keepdims=True)    # (1, 1)
    out_ref[...] = s * jnp.float32(inv_total)


# ---------------------------------------------------------------------------
# Streaming path: lane-dense (rows, 128) tiles, VPU-only (8,128) accumulator.
# ---------------------------------------------------------------------------
def _streaming_kernel(yp_ref, yt_ref, out_ref, acc_ref, *,
                      threshold_rot, alpha_rot, threshold_trans, alpha_trans,
                      tiles_per_split, tile_rows, valid_rows, needs_mask):
    i = pl.program_id(1)

    @pl.when(i == 0)
    def _init():
        acc_ref[...] = jnp.zeros_like(acc_ref)

    # Lane-constant threshold/alpha vectors.  D is even, so flat-index parity
    # == column parity == lane parity in the (rows, 128) repack.
    lane = lax.broadcasted_iota(jnp.int32, (1, _LANES), 1)
    is_rot = (lane & 1) == 0
    thr = jnp.where(is_rot, threshold_rot, threshold_trans)      # (1, 128)
    alpha = jnp.where(is_rot, alpha_rot, alpha_trans)            # (1, 128)

    yt = yt_ref[...].astype(jnp.float32)
    abs_yt = jnp.abs(yt)
    w = jnp.where(abs_yt >= thr, alpha * abs_yt, 1.0)
    diff = yp_ref[...].astype(jnp.float32) - yt
    sq = diff * diff * w                                         # (tile_rows, 128)

    if needs_mask:
        # Zero rows of the (possibly clamped) last tile that lie past the data.
        # Use a select (not a multiply): out-of-range data may be junk / NaN.
        row0 = (pl.program_id(0) * tiles_per_split + i) * tile_rows
        row = row0 + lax.broadcasted_iota(jnp.int32, (tile_rows, _LANES), 0)
        sq = jnp.where(row < valid_rows, sq, 0.0)

    # Fold rows into the (8, 128) running partials with VPU adds only; the
    # single cross-lane reduce and the 1/n scale happen once, outside.
    acc_ref[...] += jnp.sum(
        sq.reshape(tile_rows // _SUBLANES, _SUBLANES, _LANES), axis=0)

    @pl.when(i == pl.num_programs(1) - 1)
    def _finalize():
        out_ref[0] = acc_ref[...]


def weighted_mse_loss(y_pred, y_true, *,
                      threshold_rot=0.05, alpha_rot=200.0,
                      threshold_trans=1.0, alpha_trans=10.0,
                      num_splits=None, max_tile_rows=None):
    """Weighted MSE loss.  bf16 inputs are supported (upcast in-kernel)."""
    assert y_pred.shape == y_true.shape
    assert y_true.ndim == 2 and y_true.shape[1] % 2 == 0, (
        "features dim must be even (alternating rot/trans columns)")

    n_rows, n_cols = y_true.shape
    total = n_rows * n_cols
    params = dict(threshold_rot=float(threshold_rot), alpha_rot=float(alpha_rot),
                  threshold_trans=float(threshold_trans),
                  alpha_trans=float(alpha_trans))

    # ---------------- small-input path: single launch, scalar out ----------
    if (n_rows <= _SMALL_MAX_ROWS
            and n_rows * _round_up(n_cols, _LANES) <= _SMALL_MAX_ELEMS):
        kernel = functools.partial(_small_kernel, inv_total=1.0 / total, **params)
        out = pl.pallas_call(
            kernel,
            out_shape=jax.ShapeDtypeStruct((1, 1), jnp.float32),
        )(y_pred, y_true)
        return out[0, 0]

    # ---------------- streaming path ---------------------------------------
    auto_splits, tile_cap, vmem_limit = _hw_config()
    ns = int(num_splits) if num_splits is not None else auto_splits
    if max_tile_rows is not None:
        tile_cap = int(max_tile_rows)

    if total % _ALIGN_ELEMS == 0:
        # Zero-copy: reshape of a contiguous row-major array is a free bitcast.
        rows = total // _LANES
        yp2 = y_pred.reshape(rows, _LANES)
        yt2 = y_true.reshape(rows, _LANES)
    else:
        # TODO(synk): ragged-large inputs still pay one repack copy; a fully
        # zero-copy version would mask the flat tail in-kernel via a 1-D view.
        padded = _round_up(total, _ALIGN_ELEMS)
        rows = padded // _LANES
        yp2 = jnp.pad(y_pred.reshape(-1), (0, padded - total)).reshape(rows, _LANES)
        yt2 = jnp.pad(y_true.reshape(-1), (0, padded - total)).reshape(rows, _LANES)

    tile_rows = min(tile_cap, _round_up(pl.cdiv(rows, ns), _ROW_ALIGN))
    tile_rows = max(_ROW_ALIGN, (tile_rows // _ROW_ALIGN) * _ROW_ALIGN)
    tiles_per_split = pl.cdiv(rows, ns * tile_rows)
    coverage = ns * tiles_per_split * tile_rows
    needs_mask = coverage != rows
    last_block = pl.cdiv(rows, tile_rows) - 1

    def in_index_map(c, i):
        # Clamp so tiles that fall entirely past the end (possible only when
        # the row range does not divide evenly across splits) re-read a valid
        # block; the in-kernel row mask zeroes their contribution.
        return (jnp.minimum(c * tiles_per_split + i, last_block), 0)

    in_spec = pl.BlockSpec((tile_rows, _LANES), in_index_map)

    kernel = functools.partial(
        _streaming_kernel, tiles_per_split=tiles_per_split, tile_rows=tile_rows,
        valid_rows=rows, needs_mask=needs_mask, **params)

    itemsize = jnp.dtype(y_true.dtype).itemsize
    cost = pl.CostEstimate(
        flops=8 * rows * _LANES,
        transcendentals=0,
        bytes_accessed=2 * rows * _LANES * itemsize
        + ns * _SUBLANES * _LANES * 4)

    partials = pl.pallas_call(
        kernel,
        out_shape=jax.ShapeDtypeStruct((ns, _SUBLANES, _LANES), jnp.float32),
        grid_spec=pltpu.PrefetchScalarGridSpec(
            num_scalar_prefetch=0,
            grid=(ns, tiles_per_split),
            in_specs=[in_spec, in_spec],
            out_specs=pl.BlockSpec((1, _SUBLANES, _LANES),
                                   lambda c, i: (c, 0, 0)),
            scratch_shapes=[pltpu.VMEM((_SUBLANES, _LANES), jnp.float32)]),
        compiler_params=pltpu.CompilerParams(
            # TODO(synk): on v7x verify that "parallel" actually shards the
            # split axis across both TensorCores; if not, switch that axis to
            # pltpu.CORE_PARALLEL.
            dimension_semantics=("parallel", "arbitrary"),
            vmem_limit_bytes=vmem_limit),
        cost_estimate=cost,
    )(yp2, yt2)

    # One cross-lane reduction + constant 1/n scaling, done once outside.
    return jnp.sum(partials) * jnp.float32(1.0 / total)


def _reference(y_pred, y_true, threshold_rot=0.05, alpha_rot=200.0,
               threshold_trans=1.0, alpha_trans=10.0):
    col = (jnp.arange(y_true.shape[1]) % 2) == 0
    col = jnp.broadcast_to(col[None, :], y_true.shape)
    abs_yt = jnp.abs(y_true)
    w = jnp.where(
        col,
        jnp.where(abs_yt >= threshold_rot, alpha_rot * abs_yt, 1.0),
        jnp.where(abs_yt >= threshold_trans, alpha_trans * abs_yt, 1.0))
    return jnp.mean(jnp.square(y_pred - y_true) * w)


if __name__ == "__main__":
    key = jax.random.PRNGKey(0)

    cases = [
        dict(shape=(8, 8)),                                      # small path
        dict(shape=(37, 14)),                                    # small path, ragged dims
        dict(shape=(4096, 16)),                                  # streaming, zero-copy aligned
        dict(shape=(4096, 16), num_splits=2, max_tile_rows=48),  # streaming w/ mask + clamp
        dict(shape=(2100, 6)),                                   # streaming, ragged tail
    ]
    for case in cases:
        B, D = case["shape"]
        key, k1, k2 = jax.random.split(key, 3)
        y_true = jax.random.normal(k1, (B, D), dtype=jnp.float32)
        y_pred = y_true + 0.1 * jax.random.normal(k2, (B, D), dtype=jnp.float32)

        kwargs = {k: v for k, v in case.items() if k != "shape"}
        loss = weighted_mse_loss(y_pred, y_true, **kwargs)
        jax.block_until_ready(loss)

        ref = _reference(y_pred, y_true)
        assert jnp.allclose(loss, ref, rtol=1e-4, atol=1e-6), (case, loss, ref)

    print("KERNEL_OK")
</pallas_src>

<mosaic_0001>
module attributes {stable_mosaic.version = 11 : i64} {
  func.func @_small_kernel(%arg0: memref<8x8xf32, #tpu.memory_space<vmem>>, %arg1: memref<8x8xf32, #tpu.memory_space<vmem>>, %arg2: memref<1x1xf32, #tpu.memory_space<vmem>>) attributes {dimension_semantics = [], scalar_prefetch = 0 : i64, scratch_operands = 0 : i64, tpu.core_type = #tpu.core_type<tc>} {
    %c0 = arith.constant 0 : index
    %c0_0 = arith.constant 0 : index
    %0 = vector.load %arg1[%c0, %c0_0] : memref<8x8xf32, #tpu.memory_space<vmem>>, vector<8x8xf32>
    %c0_1 = arith.constant 0 : index
    %c0_2 = arith.constant 0 : index
    %1 = vector.load %arg0[%c0_1, %c0_2] : memref<8x8xf32, #tpu.memory_space<vmem>>, vector<8x8xf32>
    %2 = tpu.iota {dimensions = array<i32: 1>} : vector<8x8xi32>
    %c1_i32 = arith.constant 1 : i32
    %3 = vector.broadcast %c1_i32 : i32 to vector<8x8xi32>
    %4 = arith.andi %2, %3 : vector<8x8xi32>
    %c0_i32 = arith.constant 0 : i32
    %5 = vector.broadcast %c0_i32 : i32 to vector<8x8xi32>
    %6 = arith.cmpi eq, %4, %5 : vector<8x8xi32>
    %cst = arith.constant 5.000000e-02 : f32
    %cst_3 = arith.constant 1.000000e+00 : f32
    %7 = vector.broadcast %cst : f32 to vector<8x8xf32>
    %8 = vector.broadcast %cst_3 : f32 to vector<8x8xf32>
    %9 = arith.select %6, %7, %8 : vector<8x8xi1>, vector<8x8xf32>
    %cst_4 = arith.constant 2.000000e+02 : f32
    %cst_5 = arith.constant 1.000000e+01 : f32
    %10 = vector.broadcast %cst_4 : f32 to vector<8x8xf32>
    %11 = vector.broadcast %cst_5 : f32 to vector<8x8xf32>
    %12 = arith.select %6, %10, %11 : vector<8x8xi1>, vector<8x8xf32>
    %13 = math.absf %0 : vector<8x8xf32>
    %14 = arith.cmpf oge, %13, %9 : vector<8x8xf32>
    %15 = arith.mulf %12, %13 : vector<8x8xf32>
    %cst_6 = arith.constant 1.000000e+00 : f32
    %16 = vector.broadcast %cst_6 : f32 to vector<8x8xf32>
    %17 = arith.select %14, %15, %16 : vector<8x8xi1>, vector<8x8xf32>
    %18 = arith.subf %1, %0 : vector<8x8xf32>
    %19 = arith.mulf %18, %18 : vector<8x8xf32>
    %20 = arith.mulf %19, %17 : vector<8x8xf32>
    %cst_7 = arith.constant dense<0.000000e+00> : vector<8xf32>
    %21 = vector.multi_reduction <add>, %20, %cst_7 [1] : vector<8x8xf32> to vector<8xf32>
    %22 = vector.shape_cast %21 : vector<8xf32> to vector<8x1xf32>
    %cst_8 = arith.constant dense<0.000000e+00> : vector<1xf32>
    %23 = vector.multi_reduction <add>, %22, %cst_8 [0] : vector<8x1xf32> to vector<1xf32>
    %24 = vector.shape_cast %23 : vector<1xf32> to vector<1x1xf32>
    %cst_9 = arith.constant 1.562500e-02 : f32
    %25 = vector.broadcast %cst_9 : f32 to vector<1x1xf32>
    %26 = arith.mulf %24, %25 : vector<1x1xf32>
    %c0_10 = arith.constant 0 : index
    %c0_11 = arith.constant 0 : index
    %27 = vector.load %arg2[%c0_10, %c0_11] : memref<1x1xf32, #tpu.memory_space<vmem>>, vector<1x1xf32>
    tpu.vector_store %arg2[%c0_10, %c0_11], %26 {strides = array<i32>} : memref<1x1xf32, #tpu.memory_space<vmem>>, vector<1x1xf32>,
    return
  }
}

</mosaic_0001>

<bundles_post_ra>
// kernel: tpu_custom_call.1
= control target key start
LH: loop header
LB: loop body
LE: loop exit
PB: predicated region body
PF: predicated region fallthrough
CT: control target
= control target key end

     0   :  { %7 = vsyncpa [#allocation3], 0  ;;  %s180_s0 = inlined_call_operand.hbm [shape: f32[8,8], index: 0, kind: input, shape index: {}]   ;;  %s181_s1 = inlined_call_operand.hbm [shape: f32[8,8], index: 1, kind: input, shape index: {}]   ;;  %s182_s2 = inlined_call_operand.hbm [shape: f32[1,1], index: 2, kind: output, shape index: {}]  }
   0x1   :  { %8 = vsyncpa [#allocation6], 0 }
   0x2   :  { %9 = vsyncpa [#allocation4], 0  ;;  %s151_s9 = smov [#allocation2]   ;;  %s152_s11 = smov [#allocation5]  }
   0x3   :  { %s16_s10 = sshll.u32 %s151_s9, 4  ;;  %s26_s12 = sshll.u32 %s152_s11, 4  ;;  %s17_s10 = int_to_ptr.vmem [resolvable:$true] %s16_s10  ;;  %s27_s12 = int_to_ptr.vmem [resolvable:$true] %s26_s12 }
   0x4   :  { %s93_s13 = scalar_lea.vmem %s17_s10, 128  ;;  %p98_p1 = scmp.lt.s32.totalorder %s17_s10, %s17_s10 }
   0x5   :  { %p94_p0 = scmp.ne.s32.totalorder %s17_s10, %s93_s13  ;;  %p99_p2 = scmp.lt.s32.totalorder %s93_s13, %s93_s13 }
   0x7   :  { %p100_p3 = por %p99_p2, %p98_p1 }
   0x9   :  { %p101_p4 = pnand %p100_p3, %p94_p0 }
   0xb   :  { %104 = shalt.err (!%p101_p4)
}
   0xc   :  { %19 = dma.hbm_to_vmem [thread:$0]  %s180_s0, 128, %s17_s10, [#allocation3]  }
   0xd   :  { %s113_s16 = scalar_lea.vmem %s27_s12, 128  ;;  %p118_p6 = scmp.lt.s32.totalorder %s27_s12, %s27_s12 }
   0xe   :  { %p114_p5 = scmp.ne.s32.totalorder %s27_s12, %s113_s16  ;;  %p119_p7 = scmp.lt.s32.totalorder %s113_s16, %s113_s16 }
  0x10   :  { %p120_p8 = por %p119_p7, %p118_p6 }
  0x12   :  { %p121_p9 = pnand %p120_p8, %p114_p5 }
  0x14   :  { %124 = shalt.err (!%p121_p9)
}
  0x15   :  { %29 = dma.hbm_to_vmem [thread:$0]  %s181_s1, 128, %s27_s12, [#allocation6]  }
  0x16   :  { %145 = dma.done.wait [#allocation3], 128  }
  0x17   :  { %146 = vsyncadd [#allocation3], 4294967168 }
  0x18   :  { %147 = dma.done.wait [#allocation6], 128  }
  0x19   :  { %148 = vsyncadd [#allocation6], 4294967168  ;;  %v38_v0 = vlaneseq  ;;  %v36_v3 = vld [vmem:[#allocation5] sm:$0xff]  ;;  %v37_v4 = vld [vmem:[#allocation2] sm:$0xff]  ;;  %v153_v5 = vmov 1.0   ;;  %v154_v7 = vmov 10.0  }
  0x1a   :  { %v44_v9 = vand.u32 2147483647, %v36_v3  ;;  %v48_v10 = vsub.f32 %v37_v4, %v36_v3  ;;  %vm51_vm2 = vcmask 64512   ;;  %s155_s0 = smov [#allocation7]   ;;  %vm62_vm3 = vcmask 0  }
  0x1b   :  { %v39_v1 = vand.u32 127, %v38_v0  ;;  %s70_s1 = sshll.u32 %s155_s0, 4  ;;  %s71_s1 = int_to_ptr.vmem [resolvable:$true] %s70_s1 }
  0x1c   :  { %v49_v12 = vmul.f32 %v48_v10, %v48_v10  ;;  %s125_s19 = scalar_lea.vmem %s71_s1, 16  ;;  %s129_s20 = scalar_lea.vmem %s71_s1, 32 }
  0x1d   :  { %v40_v2 = vand.u32 1, %v39_v1  ;;  %p126_p10 = scmp.ne.s32.totalorder %s71_s1, %s125_s19  ;;  %p130_p11 = scmp.lt.s32.totalorder %s71_s1, %s71_s1 }
  0x1e   :  { %p131_p12 = scmp.lt.s32.totalorder %s129_s20, %s125_s19 }
  0x1f   :  { %vm41_vm0 = vcmp.eq.s32.totalorder %v40_v2, 0 }
  0x20   :  { %v42_v6 = vsel %vm41_vm0, 0.05, %v153_v5  ;;  %v43_v8 = vsel %vm41_vm0, 200.0, %v154_v7  ;;  %p132_p13 = por %p131_p12, %p130_p11 }
  0x21   :  { %vm45_vm1 = vcmp.ge.f32.partialorder %v44_v9, %v42_v6  ;;  %v46_v11 = vmul.f32 %v44_v9, %v43_v8 }
  0x22   :  { %p133_p0 = pnand %p132_p13, %p126_p10 }
  0x23   :  { %v47_v13 = vsel %vm45_vm1, %v46_v11, 1.0 }
  0x24   :  { %v50_v14 = vmul.f32 %v49_v12, %v47_v13 }
  0x26   :  { %v52_v15 = vsel %vm51_vm2, %v50_v14, 0.0 }
  0x27   :  { %53 = vadd.xlane.f32.xlu0 %v52_v15 }
  0xb0   :  { %v54_v16 = vpop.xlane.xlu0 %53 }
  0xb1   :  { %v55_v17 = vrot.slane %v54_v16, 4 }
  0xb3   :  { %v56_v18 = vadd.f32 %v55_v17, %v54_v16 }
  0xb5   :  { %v57_v19 = vrot.slane %v56_v18, 2 }
  0xb7   :  { %v58_v20 = vadd.f32 %v57_v19, %v56_v18 }
  0xb9   :  { %v59_v21 = vrot.slane %v58_v20, 1 }
  0xbb   :  { %v60_v22 = vadd.f32 %v59_v21, %v58_v20 }
  0xbd   :  { %v61_v23 = vmul.f32 0.015625, %v60_v22 }
  0xbf   :  { %63 = vst.msk [vmem:[#allocation7] sm:$0x1] %vm62_vm3, %v61_v23 }
  0xc0   :  { %136 = shalt.err (!%p133_p0)
}
  0xc1   :  { %73 = dma.vmem_to_hbm [thread:$0]  %s71_s1, 16, %s182_s2, [#allocation4]  }
  0xc2   :  { %149 = dma.done.wait [#allocation4], 16  }
  0xc3   :  { %150 = vsyncadd [#allocation4], 4294967280 }
  0xc4   :  { %77 = vsyncpa [#allocation3], 1 }
  0xc5   :  { %78 = vsyncpa [#allocation6], 1 }
  0xc6   :  { %79 = vsyncpa [#allocation4], 1 }

</bundles_post_ra>
